<compile_context>
chip_gen: v5e
topology: v5e:2x2
jax: 0.10.0
libtpu: 0.0.40
codegen_flags: <defaults>
</compile_context>

<pallas_src>
import jax
import jax.numpy as jnp
from jax.experimental import pallas as pl
from jax.experimental.pallas import tpu as pltpu


def _round_up(x, m):
    return ((x + m - 1) // m) * m


# ---------------------------------------------------------------------------
# Kernel 1: whole (padded) vocab in a single tile per row block.
# ---------------------------------------------------------------------------
def _mlm_kernel_single(x_ref, w_ref, b_ref, o_ref):
    # x_ref: (tm, hidden) bf16   w_ref: (hidden, Vp) bf16
    # b_ref: (1, Vp) f32         o_ref: (tm, Vp) f32
    logits = jnp.dot(x_ref[...], w_ref[...], preferred_element_type=jnp.float32)
    logits = logits + b_ref[...]
    m = jnp.max(logits, axis=-1, keepdims=True)
    l = jnp.sum(jnp.exp(logits - m), axis=-1, keepdims=True)
    o_ref[...] = (logits - (m + jnp.log(l))).astype(o_ref.dtype)


# ---------------------------------------------------------------------------
# Kernel 2: vocab streamed in tn-wide tiles with an online logsumexp.
# ---------------------------------------------------------------------------
def _mlm_kernel_streamed(x_ref, w_ref, b_ref, o_ref, m_sc, l_sc):
    # x_ref: (tm, hidden) bf16       w_ref: (hidden, tn) bf16
    # b_ref: (1, tn) f32             o_ref: (tm, Vp) f32 (resident across j)
    # m_sc / l_sc: (tm, 1) f32 running max / running sum-of-exp
    j = pl.program_id(1)
    tn = w_ref.shape[1]

    @pl.when(j == 0)
    def _init():
        m_sc[...] = jnp.full_like(m_sc, -jnp.inf)
        l_sc[...] = jnp.zeros_like(l_sc)

    # bf16 MXU matmul with f32 accumulation; bias add in f32.
    logits = jnp.dot(x_ref[...], w_ref[...], preferred_element_type=jnp.float32)
    logits = logits + b_ref[...]

    # Online logsumexp update across vocab tiles.
    m_prev = m_sc[...]
    m_new = jnp.maximum(m_prev, jnp.max(logits, axis=-1, keepdims=True))
    alpha = jnp.exp(m_prev - m_new)
    l_sc[...] = alpha * l_sc[...] + jnp.sum(jnp.exp(logits - m_new),
                                            axis=-1, keepdims=True)
    m_sc[...] = m_new

    # Lane-dense store of this tile's raw logits into the resident output block.
    start = pl.multiple_of(j * tn, tn)
    o_ref[:, pl.ds(start, tn)] = logits.astype(o_ref.dtype)

    @pl.when(j == pl.num_programs(1) - 1)
    def _finalize():
        lse = m_sc[...] + jnp.log(l_sc[...])        # (tm, 1)
        o_ref[...] = o_ref[...] - lse               # log_softmax = logits - lse


def masked_language_model(x, w, b, *, tm=None, tn=None,
                          vmem_budget_bytes=40 * 1024 * 1024):
    """x: (batch, seq, hidden), w: (hidden, vocab), b: (vocab,) -> (batch, seq, vocab)."""
    batch, seq, hidden = x.shape
    vocab = w.shape[1]
    M = batch * seq
    Mp8 = _round_up(M, 8)

    # ------------------------------------------------------------------
    # Path selection: single-sweep if the whole padded vocab fits a tile.
    # ------------------------------------------------------------------
    Vp1 = _round_up(vocab, 128)

    def single_need(tm_):
        return (2 * tm_ * hidden * 2       # bf16 x tile (double-buffered)
                + 2 * hidden * Vp1 * 2     # bf16 W (conservatively x2)
                + 2 * Vp1 * 4              # f32 bias
                + 2 * tm_ * Vp1 * 4)       # f32 output block (double-buffered)

    tm_single = min(512, Mp8)
    while tm_single > 8 and single_need(tm_single) > vmem_budget_bytes:
        tm_single = max(8, _round_up(tm_single // 2, 8))
    use_single = (tm is None and tn is None
                  and single_need(tm_single) <= vmem_budget_bytes
                  and (tm_single >= 256 or tm_single >= Mp8))

    # ---- prepare (padded, bf16 / f32) operands shared by both paths ----
    def pad_vocab(w2, b2, Vp):
        if Vp != vocab:
            w2 = jnp.pad(w2, ((0, 0), (0, Vp - vocab)))
            b2 = jnp.pad(b2, ((0, 0), (0, Vp - vocab)), constant_values=-1e30)
        return w2, b2

    if use_single:
        tm_s = tm_single
        Mp = _round_up(M, tm_s)
        x2 = x.reshape(M, hidden).astype(jnp.bfloat16)
        if Mp != M:
            x2 = jnp.pad(x2, ((0, Mp - M), (0, 0)))
        w2, b2 = pad_vocab(w.astype(jnp.bfloat16),
                           b.astype(jnp.float32).reshape(1, vocab), Vp1)

        out = pl.pallas_call(
            _mlm_kernel_single,
            out_shape=jax.ShapeDtypeStruct((Mp, Vp1), jnp.float32),
            grid_spec=pltpu.PrefetchScalarGridSpec(
                num_scalar_prefetch=0,
                grid=(Mp // tm_s,),
                in_specs=[
                    pl.BlockSpec((tm_s, hidden), lambda i: (i, 0)),  # x row tile
                    pl.BlockSpec((hidden, Vp1), lambda i: (0, 0)),   # full W (resident)
                    pl.BlockSpec((1, Vp1), lambda i: (0, 0)),        # full bias
                ],
                out_specs=pl.BlockSpec((tm_s, Vp1), lambda i: (i, 0)),
            ),
            compiler_params=pltpu.CompilerParams(
                dimension_semantics=("parallel",),
                vmem_limit_bytes=48 * 1024 * 1024,
            ),
        )(x2, w2, b2)
        return out[:M, :vocab].reshape(batch, seq, vocab)

    # ------------------------------------------------------------------
    # Streamed path (large vocab): online logsumexp across vocab tiles.
    # ------------------------------------------------------------------
    if tn is None:
        tn = 128
        for cand in (1024, 512, 256):
            if _round_up(vocab, cand) - vocab <= max(vocab // 8, 128):
                tn = cand
                break
    tn = max(128, _round_up(tn, 128))
    Vp = _round_up(vocab, tn)

    if tm is None:
        def stream_need(tm_):
            return (2 * tm_ * Vp * 4         # resident f32 output block (x2 buffers)
                    + 2 * tm_ * hidden * 2   # bf16 x tile
                    + 2 * hidden * tn * 2    # bf16 W tile (double-buffered)
                    + 2 * tn * 4             # bias tile
                    + 4 * tm_ * 4)           # (tm,1) scratch accumulators
        tm = min(512, Mp8)
        while tm > 8 and stream_need(tm) > vmem_budget_bytes:
            tm = max(8, _round_up(tm // 2, 8))
    tm = max(8, min(tm, Mp8))
    Mp = _round_up(M, tm)

    x2 = x.reshape(M, hidden).astype(jnp.bfloat16)
    if Mp != M:
        x2 = jnp.pad(x2, ((0, Mp - M), (0, 0)))
    w2, b2 = pad_vocab(w.astype(jnp.bfloat16),
                       b.astype(jnp.float32).reshape(1, vocab), Vp)

    grid = (Mp // tm, Vp // tn)

    out = pl.pallas_call(
        _mlm_kernel_streamed,
        out_shape=jax.ShapeDtypeStruct((Mp, Vp), jnp.float32),
        grid_spec=pltpu.PrefetchScalarGridSpec(
            num_scalar_prefetch=0,
            grid=grid,
            in_specs=[
                pl.BlockSpec((tm, hidden), lambda i, j: (i, 0)),   # x row tile
                pl.BlockSpec((hidden, tn), lambda i, j: (0, j)),   # streamed W tile
                pl.BlockSpec((1, tn), lambda i, j: (0, j)),        # bias tile
            ],
            # full-vocab output block, resident across j (the vocab axis)
            out_specs=pl.BlockSpec((tm, Vp), lambda i, j: (i, 0)),
            scratch_shapes=[
                pltpu.VMEM((tm, 1), jnp.float32),   # running max
                pltpu.VMEM((tm, 1), jnp.float32),   # running sum of exp
            ],
        ),
        compiler_params=pltpu.CompilerParams(
            dimension_semantics=("parallel", "arbitrary"),
            vmem_limit_bytes=48 * 1024 * 1024,
        ),
    )(x2, w2, b2)

    return out[:M, :vocab].reshape(batch, seq, vocab)


if __name__ == "__main__":
    batch, seq, hidden, vocab = 2, 8, 32, 128

    key = jax.random.PRNGKey(0)
    kx, kw, kb = jax.random.split(key, 3)

    # Deterministic parameter init (mimics nn.Linear's U(-1/sqrt(hidden), 1/sqrt(hidden)))
    bound = 1.0 / (hidden ** 0.5)
    w = jax.random.uniform(kw, (hidden, vocab), jnp.float32, -bound, bound)
    b = jax.random.uniform(kb, (vocab,), jnp.float32, -bound, bound)
    x = jax.random.normal(kx, (batch, seq, hidden), jnp.float32)

    out = masked_language_model(x, w, b)
    out = jax.block_until_ready(out)

    # Sanity check against pure-JAX reference (looser tolerance: bf16 MXU inputs)
    ref = jax.nn.log_softmax(x @ w + b, axis=-1)
    assert out.shape == (batch, seq, vocab)
    assert jnp.allclose(out, ref, atol=2e-2, rtol=2e-2), float(jnp.max(jnp.abs(out - ref)))

    # Also exercise the streamed (online-logsumexp) path for correctness.
    out2 = masked_language_model(x, w, b, tm=8, tn=128)
    out2 = jax.block_until_ready(out2)
    assert jnp.allclose(out2, ref, atol=2e-2, rtol=2e-2), float(jnp.max(jnp.abs(out2 - ref)))

    print("KERNEL_OK")
</pallas_src>

<mosaic_0001>
module attributes {stable_mosaic.version = 11 : i64} {
  func.func @_mlm_kernel_single(%arg0: i32, %arg1: memref<16x32xbf16, #tpu.memory_space<vmem>>, %arg2: memref<32x128xbf16, #tpu.memory_space<vmem>>, %arg3: memref<1x128xf32, #tpu.memory_space<vmem>>, %arg4: memref<16x128xf32, #tpu.memory_space<vmem>>) attributes {dimension_semantics = [#tpu.dimension_semantics<parallel>], iteration_bounds = array<i64: 1>, scalar_prefetch = 0 : i64, scratch_operands = 0 : i64, tpu.core_type = #tpu.core_type<tc>, window_params = [{transform_indices = @transform_0, window_bounds = array<i64: 16, 32>}, {pipeline_mode = #tpu.pipeline_mode<synchronous>, transform_indices = @transform_1, window_bounds = array<i64: 32, 128>}, {pipeline_mode = #tpu.pipeline_mode<synchronous>, transform_indices = @transform_2, window_bounds = array<i64: 1, 128>}, {transform_indices = @transform_3, window_bounds = array<i64: 16, 128>}]} {
    %c0 = arith.constant 0 : index
    %c0_0 = arith.constant 0 : index
    %0 = vector.load %arg1[%c0, %c0_0] : memref<16x32xbf16, #tpu.memory_space<vmem>>, vector<16x32xbf16>
    %c0_1 = arith.constant 0 : index
    %c0_2 = arith.constant 0 : index
    %1 = vector.load %arg2[%c0_1, %c0_2] : memref<32x128xbf16, #tpu.memory_space<vmem>>, vector<32x128xbf16>
    %cst = arith.constant dense<0.000000e+00> : vector<16x128xf32>
    %2 = tpu.matmul %0, %1, %cst {dimension_numbers = #tpu.dot_dimension_numbers<[1], [0], [0], [1], [0, 0, 1, 1], [], []>} : vector<16x32xbf16>, vector<32x128xbf16>, vector<16x128xf32> -> vector<16x128xf32>
    %c0_3 = arith.constant 0 : index
    %c0_4 = arith.constant 0 : index
    %3 = vector.load %arg3[%c0_3, %c0_4] : memref<1x128xf32, #tpu.memory_space<vmem>>, vector<1x128xf32>
    %4 = vector.broadcast %3 : vector<1x128xf32> to vector<16x128xf32>
    %5 = arith.addf %2, %4 : vector<16x128xf32>
    %cst_5 = arith.constant dense<0xFF800000> : vector<16xf32>
    %6 = vector.multi_reduction <maximumf>, %5, %cst_5 [1] : vector<16x128xf32> to vector<16xf32>
    %7 = vector.shape_cast %6 : vector<16xf32> to vector<16x1xf32>
    %8 = vector.broadcast %7 : vector<16x1xf32> to vector<16x128xf32>
    %9 = arith.subf %5, %8 : vector<16x128xf32>
    %10 = math.exp %9 : vector<16x128xf32>
    %cst_6 = arith.constant dense<0.000000e+00> : vector<16xf32>
    %11 = vector.multi_reduction <add>, %10, %cst_6 [1] : vector<16x128xf32> to vector<16xf32>
    %12 = vector.shape_cast %11 : vector<16xf32> to vector<16x1xf32>
    %13 = math.log %12 : vector<16x1xf32>
    %14 = arith.addf %7, %13 : vector<16x1xf32>
    %15 = vector.broadcast %14 : vector<16x1xf32> to vector<16x128xf32>
    %16 = arith.subf %5, %15 : vector<16x128xf32>
    %c0_7 = arith.constant 0 : index
    %c0_8 = arith.constant 0 : index
    %17 = vector.load %arg4[%c0_7, %c0_8] : memref<16x128xf32, #tpu.memory_space<vmem>>, vector<16x128xf32>
    tpu.vector_store %arg4[%c0_7, %c0_8], %16 {strides = array<i32>} : memref<16x128xf32, #tpu.memory_space<vmem>>, vector<16x128xf32>,
    return
  }
  func.func @transform_0(%arg0: i32) -> (i32, i32) {
    %c0_i32 = arith.constant 0 : i32
    %c0_i32_0 = arith.constant 0 : i32
    return %arg0, %c0_i32 : i32, i32
  }
  func.func @transform_1(%arg0: i32) -> (i32, i32) {
    %c0_i32 = arith.constant 0 : i32
    %c0_i32_0 = arith.constant 0 : i32
    %c0_i32_1 = arith.constant 0 : i32
    return %c0_i32, %c0_i32_0 : i32, i32
  }
  func.func @transform_2(%arg0: i32) -> (i32, i32) {
    %c0_i32 = arith.constant 0 : i32
    %c0_i32_0 = arith.constant 0 : i32
    %c0_i32_1 = arith.constant 0 : i32
    return %c0_i32, %c0_i32_0 : i32, i32
  }
  func.func @transform_3(%arg0: i32) -> (i32, i32) {
    %c0_i32 = arith.constant 0 : i32
    %c0_i32_0 = arith.constant 0 : i32
    return %arg0, %c0_i32 : i32, i32
  }
}

</mosaic_0001>

<bundles_post_ra>
// kernel: tpu_custom_call.1
= control target key start
LH: loop header
LB: loop body
LE: loop exit
PB: predicated region body
PF: predicated region fallthrough
CT: control target
= control target key end

     0   :  { %8 = vsyncpa [#allocation3], 0  ;;  %s286_s0 = inlined_call_operand.hbm [shape: bf16[16,32], index: 0, kind: input, shape index: {}]   ;;  %s287_s1 = inlined_call_operand.hbm [shape: bf16[32,128], index: 1, kind: input, shape index: {}]   ;;  %s288_s2 = inlined_call_operand.vmem [shape: f32[1,128], index: 2, kind: input, shape index: {}]   ;;  %s289_s3 = inlined_call_operand.hbm [shape: f32[16,128], index: 3, kind: output, shape index: {}]  }
   0x1   :  { %9 = vsyncpa [#allocation6], 0 }
   0x2   :  { %10 = vsyncpa [#allocation4], 0  ;;  %s15_s14 = sshll.u32 %s286_s0, 4  ;;  %s247_s15 = smov [#allocation2]   ;;  %s16_s14 = int_to_ptr.hbm [resolvable:$true] %s15_s14 }
   0x3   :  { %s17_s16 = sshll.u32 %s247_s15, 4  ;;  %s28_s19 = sshll.u32 %s287_s1, 4  ;;  %s18_s16 = int_to_ptr.vmem [resolvable:$true] %s17_s16  ;;  %s29_s19 = int_to_ptr.hbm [resolvable:$true] %s28_s19 }
   0x4   :  { %s248_s20 = smov 64   ;;  %s249_s21 = smov 4  }
   0x5   :  { %23 = dma.hbm_to_vmem [thread:$0]  %s16_s14, 128, %s18_s16, [#allocation3], %s248_s20, %s248_s20, %s249_s21  }
   0x6   :  { %s250_s22 = smov [#allocation5]  }
   0x7   :  { %s30_s23 = sshll.u32 %s250_s22, 4  ;;  %s31_s23 = int_to_ptr.vmem [resolvable:$true] %s30_s23 }
   0x8   :  { %36 = dma.hbm_to_vmem [thread:$0]  %s29_s19, 256, %s31_s23, [#allocation6], %s248_s20, %s248_s20, %s249_s21  }
   0x9   :  { %241 = dma.done.wait [#allocation3], 128  }
   0xa   :  { %242 = vsyncadd [#allocation3], 4294967168 }
   0xb   :  { %243 = dma.done.wait [#allocation6], 256  }
   0xc   :  { %244 = vsyncadd [#allocation6], 4294967040  ;;  %v152_v0 = vld [vmem:[#allocation5 + $0x8] sm:$0xff]  ;;  %v151_v1 = vld [vmem:[#allocation5] sm:$0xff]  ;;  %vm75_vm0 = vcmask 261120   ;;  %s123_s27 = sshll.u32 %s289_s3, 4  ;;  %s124_s27 = int_to_ptr.hbm [resolvable:$true] %s123_s27 }
   0xd   :  { %85 = vmatpush.bf16.msra.mxu0 %v152_v0  ;;  %v150_v2 = vld [vmem:[#allocation2] sm:$0xff]  ;;  %s252_s28 = smov 128   ;;  %s253_s29 = smov 8  }
   0xe   :  { %v160_v3 = vld [vmem:[%s288_s2] ss:$0 sm:$0xff]  ;;  %s251_s2 = smov [#allocation7]  }
   0xf   :  { %s121_s24 = sshll.u32 %s251_s2, 4  ;;  %s122_s24 = int_to_ptr.vmem [resolvable:$true] %s121_s24 }
  0x11   :  { %86 = vmatpush.bf16.msra.mxu0 %v151_v1 }
  0x14   :  { %149 = vmatmul.msk.bf16.vlgmr.msra.gmra.mxu0 %vm75_vm0, %v150_v2 }
  0x91   :  { %v88_v4 = vpop.f32.mrf.mxu0 }
  0x92   :  { %v89_v5 = vadd.f32 %v160_v3, %v88_v4 }
  0x94   :  { %93 = vmax.xlane.f32.xlu0 %v89_v5 }
  0x99   :  { %v90_v6 = vpop.f32.mrf.mxu0 }
  0x9a   :  { %v91_v7 = vadd.f32 %v160_v3, %v90_v6 }
  0x9c   :  { %95 = vmax.xlane.f32.xlu0 %v91_v7 }
 0x107   :  { %v94_v8 = vpop.xlane.xlu0 %93 }
 0x108   :  { %v97_v9 = vsub.f32 %v89_v5, %v94_v8 }
 0x10a   :  { %v99_v10 = vmul.f32 1.442695, %v97_v9 }
 0x10c   :  { %161 = vpow2.f32 %v99_v10 }
 0x10f   :  { %v96_v11 = vpop.xlane.xlu0 %95 }
 0x110   :  { %v98_v12 = vsub.f32 %v91_v7, %v96_v11 }
 0x112   :  { %v162_v13 = vpop.eup %161  ;;  %v101_v14 = vmul.f32 1.442695, %v98_v12 }
 0x113   :  { %103 = vadd.xlane.f32.xlu1 %v162_v13 }
 0x114   :  { %163 = vpow2.f32 %v101_v14 }
 0x11a   :  { %v164_v15 = vpop.eup %163 }
 0x11b   :  { %105 = vadd.xlane.f32.xlu1 %v164_v15 }
 0x186   :  { %v104_v16 = vpop.xlane.xlu1 %103 }
 0x187   :  { %165 = vlog2.f32 %v104_v16 }
 0x18d   :  { %v166_v17 = vpop.eup %165 }
 0x18e   :  { %v108_v18 = vmul.f32 0.6931472, %v166_v17  ;;  %v106_v19 = vpop.xlane.xlu1 %105 }
 0x18f   :  { %167 = vlog2.f32 %v106_v19 }
 0x190   :  { %v111_v20 = vadd.f32 %v108_v18, %v94_v8 }
 0x192   :  { %v113_v21 = vsub.f32 %v89_v5, %v111_v20 }
 0x194   :  { %115 = vst [vmem:[#allocation7] sm:$0xff] %v113_v21 }
 0x195   :  { %v168_v22 = vpop.eup %167 }
 0x196   :  { %v110_v23 = vmul.f32 0.6931472, %v168_v22 }
 0x198   :  { %v112_v24 = vadd.f32 %v110_v23, %v96_v11 }
 0x19a   :  { %v114_v25 = vsub.f32 %v91_v7, %v112_v24 }
 0x19c   :  { %116 = vst [vmem:[#allocation7 + $0x8] sm:$0xff] %v114_v25 }
 0x19d   :  { %129 = dma.vmem_to_hbm [thread:$0]  %s122_s24, 256, %s124_s27, [#allocation4], %s252_s28, %s252_s28, %s253_s29  }
 0x19e   :  { %245 = dma.done.wait [#allocation4], 256  }
 0x19f   :  { %246 = vsyncadd [#allocation4], 4294967040 }
 0x1a0   :  { %134 = vsyncpa [#allocation3], 1 }
 0x1a1   :  { %135 = vsyncpa [#allocation6], 1 }
 0x1a2   :  { %136 = vsyncpa [#allocation4], 1 }

</bundles_post_ra>
